<compile_context>
chip_gen: v7x
topology: tpu7x:2x2x1
jax: 0.10.0
libtpu: 0.0.40
codegen_flags: <defaults>
</compile_context>

<pallas_src>
import math

import jax
import jax.numpy as jnp
from jax.experimental import pallas as pl
from jax.experimental.pallas import tpu as pltpu

_LANES = 128
_MiB = 1024 * 1024


def _vmem_capacity_bytes():
    """Physical VMEM of the local chip; conservative (v7x) fallback."""
    try:
        return int(pltpu.get_tpu_info().vmem_capacity_bytes)
    except Exception:
        return 64 * _MiB


def _compute_dtype_for(in_dtype):
    """Native 16-bit VPU math on v6e/v7x; f32 everywhere else."""
    d = jnp.dtype(in_dtype)
    if d == jnp.dtype(jnp.float32):
        return jnp.float32
    if d in (jnp.dtype(jnp.bfloat16), jnp.dtype(jnp.float16)):
        try:
            kind = jax.devices()[0].device_kind.lower()
        except Exception:
            kind = ""
        if "v6" in kind or "v7" in kind:
            return d.type
    return jnp.float32


def _make_global_scaler_kernel(in_min, scale, out_min, compute_dtype):
    """Kernel with the affine params baked in as compile-time constants."""

    def kernel(x_ref, o_ref):
        x = x_ref[...].astype(compute_dtype)
        o_ref[...] = ((x - in_min) * scale + out_min).astype(o_ref.dtype)

    return kernel


def global_scaler_forward(x, in_range=(0.0, 1.0), out_range=(0.0, 1.0), *,
                          donate_input=False):
    """GlobalScaler.scale applied elementwise via a Pallas TPU kernel.

    in_range / out_range must be static Python scalars (constructor args in the
    reference module); they are folded into the kernel as constants.
    """
    orig_shape = x.shape
    in_dtype = jnp.dtype(x.dtype)
    # PyTorch promotes integer inputs to float via the float Range tensors.
    out_dtype = in_dtype if jnp.issubdtype(in_dtype, jnp.floating) else jnp.dtype(jnp.float32)
    n = x.size

    # Fold the Ranges into (in_min, scale, out_min) in Python double precision.
    in_min, in_max = float(in_range[0]), float(in_range[1])
    out_min, out_max = float(out_range[0]), float(out_range[1])
    in_span = in_max - in_min
    out_span = out_max - out_min
    if in_span != 0.0:
        scale = out_span / in_span
    else:
        # IEEE out_span / 0.0 semantics, matching the reference divide.
        scale = math.inf * out_span if out_span != 0.0 else math.nan

    if n == 0:
        return jnp.zeros(orig_shape, out_dtype)

    compute_dtype = _compute_dtype_for(in_dtype)
    kernel = _make_global_scaler_kernel(in_min, scale, out_min, compute_dtype)

    in_item = in_dtype.itemsize
    out_item = jnp.dtype(out_dtype).itemsize
    max_item = max(in_item, out_item)
    min_item = min(in_item, out_item)
    # Sublane packing: 8 rows (32-bit), 16 (16-bit), 32 (8-bit) so every store
    # stays unmasked for packed dtypes.
    pack = max(8, 32 // min_item)

    # Generation-aware block sizing: ~6.4 MiB on v7x (64 MiB VMEM), 8 MiB on
    # v5e/v6e (128 MiB VMEM).
    vmem_cap = _vmem_capacity_bytes()
    block_bytes = min(8 * _MiB, vmem_cap // 10)
    total_bytes = n * max_item

    def _compiler_params(footprint_bytes):
        # footprint = double-buffered (input + output) blocks; add headroom,
        # never exceed 3/4 of physical VMEM, never go below 32 MiB (v5e's
        # default scoped limit is only 16 MiB).
        limit = int(min(0.75 * vmem_cap,
                        max(32 * _MiB, footprint_bytes + 16 * _MiB)))
        return pltpu.CompilerParams(
            dimension_semantics=("parallel",),
            vmem_limit_bytes=limit,
        )

    cost = pl.CostEstimate(
        flops=3 * n,
        transcendentals=0,
        bytes_accessed=n * (in_item + out_item),
    )
    aliases = {0: 0} if (donate_input and out_dtype == in_dtype) else {}

    if n % _LANES == 0:
        # --- Aligned path: zero-copy reshape to a lane-dense [rows, 128] slab.
        rows = n // _LANES
        x2d = x.reshape(rows, _LANES)

        bytes_per_row = _LANES * max_item
        target_rows = max(pack, (block_bytes // bytes_per_row) // pack * pack)
        if total_bytes >= 2 * _MiB:
            # Keep >= 4 grid steps so the "parallel" axis can shard across
            # both v7x TensorCores on large inputs (no effect on v5e/v6e).
            cap_rows = max(pack, (rows // 4) // pack * pack)
            target_rows = min(target_rows, cap_rows)
        tile_rows = min(rows, target_rows)     # full-extent block always legal
        num_tiles = pl.cdiv(rows, tile_rows)   # partial last block masked by Pallas
        footprint = 2 * tile_rows * _LANES * (in_item + out_item)

        out2d = pl.pallas_call(
            kernel,
            out_shape=jax.ShapeDtypeStruct((rows, _LANES), out_dtype),
            grid_spec=pltpu.PrefetchScalarGridSpec(
                num_scalar_prefetch=0,
                grid=(num_tiles,),
                in_specs=[pl.BlockSpec((tile_rows, _LANES), lambda i: (i, 0))],
                out_specs=pl.BlockSpec((tile_rows, _LANES), lambda i: (i, 0)),
            ),
            compiler_params=_compiler_params(footprint),
            cost_estimate=cost,
            input_output_aliases=aliases,
        )(x2d)
        return out2d.reshape(orig_shape)

    # --- Ragged path: no pad / slice HBM round-trips. Run directly on the
    # flat 1D array; Pallas masks the partial tail block.
    flat = x.reshape(n)
    blk_quant = pack * _LANES
    blk = max(blk_quant, (block_bytes // max_item) // blk_quant * blk_quant)
    if total_bytes >= 2 * _MiB:
        cap_elems = max(blk_quant, (n // 4) // blk_quant * blk_quant)
        blk = min(blk, cap_elems)
    if n <= blk:
        blk = n  # single full-extent block: always legal, no masking needed
    num_blocks = pl.cdiv(n, blk)
    footprint = 2 * blk * (in_item + out_item)

    out_flat = pl.pallas_call(
        kernel,
        out_shape=jax.ShapeDtypeStruct((n,), out_dtype),
        grid_spec=pltpu.PrefetchScalarGridSpec(
            num_scalar_prefetch=0,
            grid=(num_blocks,),
            in_specs=[pl.BlockSpec((blk,), lambda i: (i,))],
            out_specs=pl.BlockSpec((blk,), lambda i: (i,)),
        ),
        compiler_params=_compiler_params(footprint),
        cost_estimate=cost,
        input_output_aliases=aliases,
    )(flat)
    return out_flat.reshape(orig_shape)


def _reference(x, in_range, out_range):
    in_min, in_max = in_range
    out_min, out_max = out_range
    return (out_max - out_min) * (x - in_min) / (in_max - in_min) + out_min


if __name__ == "__main__":
    key = jax.random.PRNGKey(0)
    # Small NCHW input consistent with a conv-style module input.
    x = jax.random.normal(key, (2, 4, 16, 16), dtype=jnp.float32)

    in_range = (-2.0, 3.0)
    out_range = (0.0, 1.0)

    y = global_scaler_forward(x, in_range=in_range, out_range=out_range)
    y = jax.block_until_ready(y)

    y_ref = _reference(x, in_range, out_range)
    assert y.shape == x.shape and y.dtype == x.dtype
    assert jnp.allclose(y, y_ref, atol=1e-5, rtol=1e-5)

    print("KERNEL_OK")
</pallas_src>

<mosaic_0001>
module attributes {stable_mosaic.version = 11 : i64} {
  func.func @kernel(%arg0: i32, %arg1: memref<16x128xf32, #tpu.memory_space<vmem>>, %arg2: memref<16x128xf32, #tpu.memory_space<vmem>>) attributes {dimension_semantics = [#tpu.dimension_semantics<parallel>], iteration_bounds = array<i64: 1>, scalar_prefetch = 0 : i64, scratch_operands = 0 : i64, tpu.core_type = #tpu.core_type<tc>, window_params = [{transform_indices = @transform_0, window_bounds = array<i64: 16, 128>}, {transform_indices = @transform_1, window_bounds = array<i64: 16, 128>}]} {
    %c0 = arith.constant 0 : index
    %c0_0 = arith.constant 0 : index
    %0 = vector.load %arg1[%c0, %c0_0] : memref<16x128xf32, #tpu.memory_space<vmem>>, vector<16x128xf32>
    %cst = arith.constant -2.000000e+00 : f32
    %1 = vector.broadcast %cst : f32 to vector<16x128xf32>
    %2 = arith.subf %0, %1 : vector<16x128xf32>
    %cst_1 = arith.constant 2.000000e-01 : f32
    %3 = vector.broadcast %cst_1 : f32 to vector<16x128xf32>
    %4 = arith.mulf %2, %3 : vector<16x128xf32>
    %cst_2 = arith.constant 0.000000e+00 : f32
    %5 = vector.broadcast %cst_2 : f32 to vector<16x128xf32>
    %6 = arith.addf %4, %5 : vector<16x128xf32>
    %c0_3 = arith.constant 0 : index
    %c0_4 = arith.constant 0 : index
    %7 = vector.load %arg2[%c0_3, %c0_4] : memref<16x128xf32, #tpu.memory_space<vmem>>, vector<16x128xf32>
    tpu.vector_store %arg2[%c0_3, %c0_4], %6 {strides = array<i32>} : memref<16x128xf32, #tpu.memory_space<vmem>>, vector<16x128xf32>,
    return
  }
  func.func @transform_0(%arg0: i32) -> (i32, i32) {
    %c0_i32 = arith.constant 0 : i32
    %c0_i32_0 = arith.constant 0 : i32
    return %arg0, %c0_i32 : i32, i32
  }
  func.func @transform_1(%arg0: i32) -> (i32, i32) {
    %c0_i32 = arith.constant 0 : i32
    %c0_i32_0 = arith.constant 0 : i32
    return %arg0, %c0_i32 : i32, i32
  }
}

</mosaic_0001>

<bundles_post_ra>
// kernel: tpu_custom_call.1
= control target key start
LH: loop header
LB: loop body
LE: loop exit
PB: predicated region body
PF: predicated region fallthrough
CT: control target
= control target key end

     0   :  { %6 = vsyncpa [#allocation3], 0  ;;  %s148_s0 = inlined_call_operand.hbm [shape: f32[16,128], index: 0, kind: input, shape index: {}]   ;;  %s149_s1 = inlined_call_operand.hbm [shape: f32[16,128], index: 1, kind: output, shape index: {}]  }
   0x1   :  { %7 = vsyncpa [#allocation4], 0  ;;  %s104_s6 = smov [#allocation2]   ;;  %s56_s10 = scalar_lea.hbm %s148_s0, 256 }
   0x2   :  { %s13_s7 = sshll.u32 %s104_s6, 4  ;;  %p57_p0 = scmp.ne.s32.totalorder %s148_s0, %s56_s10  ;;  %s14_s7 = int_to_ptr.vmem [resolvable:$true] %s13_s7 }
   0x3   :  { %p60_p1 = scmp.lt.u32.totalorder %s56_s10, %s148_s0 }
   0x5   :  { %p62_p2 = pnand %p60_p1, %p57_p0 }
   0x7   :  { %65 = shalt.err (!%p62_p2)
}
   0x8   :  { %s66_s15 = scalar_lea.vmem %s14_s7, 256  ;;  %p71_p4 = scmp.lt.s32.totalorder %s14_s7, %s14_s7 }
   0x9   :  { %p67_p3 = scmp.ne.s32.totalorder %s14_s7, %s66_s15  ;;  %p72_p5 = scmp.lt.s32.totalorder %s66_s15, %s66_s15 }
   0xb   :  { %p73_p6 = por %p72_p5, %p71_p4 }
   0xd   :  { %p74_p7 = pnand %p73_p6, %p67_p3 }
   0xf   :  { %77 = shalt.err (!%p74_p7)
}
  0x10   :  { %s105_s16 = smov 128   ;;  %s106_s17 = smov 8  }
  0x11   :  { %19 = dma.hbm_to_vmem [thread:$0]  %s148_s0, 256, %s14_s7, [#allocation3], %s105_s16, %s105_s16, %s106_s17  }
  0x12   :  { %100 = dma.done.wait [#allocation3], 256  }
  0x13   :  { %101 = vsyncadd [#allocation3], 4294967040  ;;  %v23_v0 = vld [vmem:[#allocation2] sm:$0xff]  ;;  %v24_v1 = vld [vmem:[#allocation2 + $0x8] sm:$0xff]  ;;  %s107_s20 = smov [#allocation5]  }
  0x14   :  { %s38_s21 = sshll.u32 %s107_s20, 4  ;;  %v50_v2 = vadd.f32 2.0, %v23_v0  ;;  %v51_v3 = vadd.f32 2.0, %v24_v1  ;;  %s39_s21 = int_to_ptr.vmem [resolvable:$true] %s38_s21 }
  0x15   :  { %s78_s22 = scalar_lea.vmem %s39_s21, 256  ;;  %p83_p9 = scmp.lt.s32.totalorder %s39_s21, %s39_s21 }
  0x16   :  { %v27_v4 = vmul.f32 0.2, %v50_v2  ;;  %v28_v5 = vmul.f32 0.2, %v51_v3  ;;  %p79_p8 = scmp.ne.s32.totalorder %s39_s21, %s78_s22  ;;  %p84_p10 = scmp.lt.s32.totalorder %s78_s22, %s78_s22 }
  0x18   :  { %31 = vst [vmem:[#allocation5] sm:$0xff] %v27_v4  ;;  %32 = vst [vmem:[#allocation5 + $0x8] sm:$0xff] %v28_v5  ;;  %p85_p11 = por %p84_p10, %p83_p9 }
  0x1a   :  { %p86_p12 = pnand %p85_p11, %p79_p8 }
  0x1c   :  { %89 = shalt.err (!%p86_p12)
}
  0x1d   :  { %s90_s24 = scalar_lea.hbm %s149_s1, 256 }
  0x1e   :  { %p91_p13 = scmp.ne.s32.totalorder %s149_s1, %s90_s24  ;;  %p94_p0 = scmp.lt.u32.totalorder %s90_s24, %s149_s1 }
  0x20   :  { %p96_p1 = pnand %p94_p0, %p91_p13 }
  0x22   :  { %99 = shalt.err (!%p96_p1)
}
  0x23   :  { %44 = dma.vmem_to_hbm [thread:$0]  %s39_s21, 256, %s149_s1, [#allocation4], %s105_s16, %s105_s16, %s106_s17  }
  0x24   :  { %102 = dma.done.wait [#allocation4], 256  }
  0x25   :  { %103 = vsyncadd [#allocation4], 4294967040 }
  0x26   :  { %48 = vsyncpa [#allocation3], 1 }
  0x27   :  { %49 = vsyncpa [#allocation4], 1 }

</bundles_post_ra>
